<compile_context>
chip_gen: v6e
topology: v6e:2x2x1
jax: 0.10.0
libtpu: 0.0.40
codegen_flags: <defaults>
</compile_context>

<pallas_src>
import functools
import math

import jax
import jax.numpy as jnp
from jax import lax
from jax.experimental import pallas as pl
from jax.experimental.pallas import tpu as pltpu

BN_EPS = 1e-5


# --------------------------------- kernel ------------------------------------

def _stem_kernel(Ps, Wp, patches_ref, w_ref, bn_ref, out_ref):
    """One (image, row-strip) per grid step: conv1 matmul + BN + ReLU + 3x3/2 maxpool.

    patches_ref block: (1, 1, Ls, K) bf16, Ls = (2*Ps+1) * Wo, rows ordered as
      row-slots [halo/top, odd conv rows, even conv rows] x col-slots [odd cols, even cols].
    """
    cout = w_ref.shape[1]
    Lr = 2 * Ps + 1          # conv rows in this strip (incl. halo slot)
    Wo = 2 * Wp              # conv cols

    # ---- conv1: ONE bf16 MXU matmul over the full K = Cin*49, f32 accumulation ----
    acc = jnp.dot(patches_ref[0, 0], w_ref[...],
                  preferred_element_type=jnp.float32)          # (Lr*Wo, Cout) f32

    # ---- BatchNorm (scale/shift precomputed wrapper-side) + ReLU ----
    act = jnp.maximum(acc * bn_ref[0:1, :] + bn_ref[1:2, :], 0.0)
    # bf16 for the pooling stage (halves VMEM churn); values are >= 0 from here on,
    # so "missing" pool-pad contributions can simply be omitted from the max.
    act = act.astype(jnp.bfloat16).reshape(Lr, Wo, cout)       # (row-slot, col-slot, C)

    # ---- MaxPool2d(3, stride 2, pad 1), height pass: pure leading-dim slab max ----
    # pooled row R uses conv rows 2R-1 (above), 2R (center), 2R+1 (below).
    below_rows  = act[1:Ps + 1]           # odd conv rows  2R+1
    center_rows = act[Ps + 1:2 * Ps + 1]  # even conv rows 2R
    above_rows  = act[0:Ps]               # conv rows 2R-1 (slot 0 = halo, or a duplicate
                                          # of conv row 0 for strip 0 -> self-masking max)
    hm = jnp.maximum(jnp.maximum(center_rows, below_rows), above_rows)   # (Ps, Wo, C)

    # ---- width pass: col-slots are [odd cols | even cols] -> static slab slices ----
    right_cols  = hm[:, 0:Wp, :]          # conv cols 2j+1
    center_cols = hm[:, Wp:2 * Wp, :]     # conv cols 2j
    m1 = jnp.maximum(center_cols, right_cols)
    # left neighbour of pooled col j is conv col 2j-1 = right_cols[j-1]; col 0 has only
    # the (post-ReLU, >=0) zero pad on its left, so no extra term there.  The concat is
    # on the final (Ps, Wp, C) pooled array only (tiny), not on the full activation.
    pooled = jnp.concatenate(
        [m1[:, 0:1, :],
         jnp.maximum(m1[:, 1:, :], right_cols[:, 0:Wp - 1, :])],
        axis=1)                                                   # (Ps, Wp, C)

    out_ref[0, 0] = pooled.astype(out_ref.dtype)


# --------------------------------- wrapper ------------------------------------

@functools.partial(jax.jit, static_argnames=("num_strips",))
def thermal_stem_forward(params, x_nchw, num_strips=None):
    w_conv = params["conv_w"]                      # (Cout, Cin, 7, 7), PyTorch OIHW
    cout, cin_w, kh_, kw_ = w_conv.shape
    B, cin, H, W = x_nchw.shape
    assert cin == cin_w and kh_ == 7 and kw_ == 7
    assert H % 4 == 0 and W % 4 == 0, "kernel assumes H, W multiples of 4"
    Ho, Wo = H // 2, W // 2                        # conv1 output (stride 2, pad 3)
    Hp, Wp = Ho // 2, Wo // 2                      # maxpool output (stride 2, pad 1)
    K = cin * 49

    # Row strips: S strips of Ps pooled rows each (largest of 4/2/1 dividing Hp).
    if num_strips is None:
        num_strips = 4 if Hp % 4 == 0 else (2 if Hp % 2 == 0 else 1)
    S = num_strips
    assert Hp % S == 0
    Ps = Hp // S
    Lr = 2 * Ps + 1                                # conv rows per strip incl. halo slot
    Ls = Lr * Wo

    # ---- input prep: bf16 FIRST (halves every wrapper pass), NHWC, conv pad 3 ----
    x_bf = x_nchw.astype(jnp.bfloat16)
    x_nhwc = jnp.transpose(x_bf, (0, 2, 3, 1))                      # (B, H, W, Cin)
    xpad = jnp.pad(x_nhwc, ((0, 0), (3, 3), (3, 3), (0, 0)))        # (B, H+6, W+6, Cin)

    # ---- im2col (layout plumbing only, all FLOPs stay in the kernel) ----
    # k-order = (kh*7 + kw)*Cin + c ; taps concatenated along channels -> no transpose.
    taps = []
    for kh in range(7):
        for kw in range(7):
            taps.append(lax.slice(
                xpad,
                (0, kh, kw, 0),
                (B, kh + 2 * Ho - 1, kw + 2 * Wo - 1, cin),
                (1, 2, 2, 1)))                                      # (B, Ho, Wo, Cin)
    pat = jnp.concatenate(taps, axis=-1)                            # (B, Ho, Wo, K)

    # Pool-friendly column ordering: [odd conv cols | even conv cols].
    pat = jnp.concatenate([pat[:, :, 1::2, :], pat[:, :, 0::2, :]], axis=2)

    # Strip-major row ordering: [halo/top row, odd conv rows, even conv rows].
    # Strip 0's halo slot duplicates conv row 0 so the in-kernel max is self-masking.
    strips = []
    for s in range(S):
        c0 = 2 * s * Ps
        halo = pat[:, c0 - 1:c0] if s > 0 else pat[:, 0:1]
        odd = pat[:, c0 + 1:c0 + 2 * Ps:2]
        even = pat[:, c0:c0 + 2 * Ps:2]
        strips.append(jnp.concatenate([halo, odd, even], axis=1))   # (B, Lr, Wo, K)
    patches = jnp.stack(strips, axis=1).reshape(B, S, Ls, K)        # (B, S, Ls, K) bf16

    # Weight folded to (K, Cout) with matching k-order; BN scale/shift precomputed.
    wf = jnp.transpose(w_conv, (2, 3, 1, 0)).reshape(K, cout).astype(jnp.bfloat16)
    scale = params["bn_gamma"] * lax.rsqrt(params["bn_var"] + BN_EPS)
    shift = params["bn_beta"] - params["bn_mean"] * scale
    bn = jnp.stack([scale, shift], axis=0).astype(jnp.float32)      # (2, Cout)

    kernel = functools.partial(_stem_kernel, Ps, Wp)
    out = pl.pallas_call(
        kernel,
        out_shape=jax.ShapeDtypeStruct((B, S, Ps, Wp, cout), jnp.float32),
        grid_spec=pltpu.PrefetchScalarGridSpec(
            num_scalar_prefetch=0,
            grid=(B, S),
            in_specs=[
                pl.BlockSpec((1, 1, Ls, K), lambda b, s: (b, s, 0, 0)),
                pl.BlockSpec((K, cout), lambda b, s: (0, 0)),
                pl.BlockSpec((2, cout), lambda b, s: (0, 0)),
            ],
            out_specs=pl.BlockSpec((1, 1, Ps, Wp, cout),
                                   lambda b, s: (b, s, 0, 0, 0)),
        ),
        compiler_params=pltpu.CompilerParams(
            dimension_semantics=("parallel", "parallel"),
            vmem_limit_bytes=32 * 1024 * 1024,
        ),
    )(patches, wf, bn)

    out_nhwc = out.reshape(B, Hp, Wp, cout)
    return jnp.transpose(out_nhwc, (0, 3, 1, 2))   # NCHW, matching PyTorch


# --------------------------- params & plain-JAX reference ---------------------

def init_params(key, cin=3, cout=64):
    kw, kg, kb, km, kv = jax.random.split(key, 5)
    fan_in = cin * 7 * 7
    bound = 1.0 / math.sqrt(fan_in)
    return {
        "conv_w": jax.random.uniform(kw, (cout, cin, 7, 7), jnp.float32, -bound, bound),
        "bn_gamma": jax.random.uniform(kg, (cout,), jnp.float32, 0.5, 1.5),
        "bn_beta": 0.1 * jax.random.normal(kb, (cout,), jnp.float32),
        "bn_mean": 0.1 * jax.random.normal(km, (cout,), jnp.float32),
        "bn_var": jax.random.uniform(kv, (cout,), jnp.float32, 0.5, 1.5),
    }


def thermal_stem_reference(params, x_nchw):
    """Literal plain-JAX translation (f32) used to validate the kernel."""
    x = x_nchw.astype(jnp.float32)
    y = lax.conv_general_dilated(
        x, params["conv_w"].astype(jnp.float32),
        window_strides=(2, 2), padding=((3, 3), (3, 3)),
        dimension_numbers=("NCHW", "OIHW", "NCHW"),
        precision=lax.Precision.HIGHEST)
    g = params["bn_gamma"][None, :, None, None]
    b = params["bn_beta"][None, :, None, None]
    m = params["bn_mean"][None, :, None, None]
    v = params["bn_var"][None, :, None, None]
    y = (y - m) * g * lax.rsqrt(v + BN_EPS) + b
    y = jnp.maximum(y, 0.0)
    y = lax.reduce_window(y, -jnp.inf, lax.max,
                          window_dimensions=(1, 1, 3, 3),
                          window_strides=(1, 1, 2, 2),
                          padding=((0, 0), (0, 0), (1, 1), (1, 1)))
    return y


# ----------------------------------- main --------------------------------------

if __name__ == "__main__":
    B, Cin, H, W = 2, 3, 32, 32

    key = jax.random.PRNGKey(0)
    kx, kp = jax.random.split(key)
    x = jax.random.normal(kx, (B, Cin, H, W), jnp.float32)
    params = init_params(kp, Cin, 64)

    out = jax.block_until_ready(thermal_stem_forward(params, x))
    ref = thermal_stem_reference(params, x)

    assert out.shape == (B, 64, H // 4, W // 4), out.shape
    max_err = float(jnp.max(jnp.abs(out - ref)))
    # Tolerance accounts for bf16 MXU operands / bf16 pooling vs the f32 reference.
    assert bool(jnp.allclose(out, ref, rtol=2e-2, atol=2e-2)), f"max abs err = {max_err}"

    print("KERNEL_OK")
</pallas_src>

<mosaic_0001>
module attributes {stable_mosaic.version = 11 : i64} {
  func.func @_stem_kernel(%arg0: i32, %arg1: i32, %arg2: memref<1x1x80x147xbf16, #tpu.memory_space<vmem>>, %arg3: memref<147x64xbf16, #tpu.memory_space<vmem>>, %arg4: memref<2x64xf32, #tpu.memory_space<vmem>>, %arg5: memref<1x1x2x8x64xf32, #tpu.memory_space<vmem>>) attributes {dimension_semantics = [#tpu.dimension_semantics<parallel>, #tpu.dimension_semantics<parallel>], iteration_bounds = array<i64: 2, 4>, scalar_prefetch = 0 : i64, scratch_operands = 0 : i64, tpu.core_type = #tpu.core_type<tc>, window_params = [{transform_indices = @transform_0, window_bounds = array<i64: 1, 1, 80, 147>}, {pipeline_mode = #tpu.pipeline_mode<synchronous>, transform_indices = @transform_1, window_bounds = array<i64: 147, 64>}, {pipeline_mode = #tpu.pipeline_mode<synchronous>, transform_indices = @transform_2, window_bounds = array<i64: 2, 64>}, {transform_indices = @transform_3, window_bounds = array<i64: 1, 1, 2, 8, 64>}]} {
    %c0 = arith.constant 0 : index
    %c0_0 = arith.constant 0 : index
    %c0_1 = arith.constant 0 : index
    %c0_2 = arith.constant 0 : index
    %0 = vector.load %arg2[%c0, %c0_0, %c0_1, %c0_2] : memref<1x1x80x147xbf16, #tpu.memory_space<vmem>>, vector<1x1x80x147xbf16>
    %1 = vector.shape_cast %0 : vector<1x1x80x147xbf16> to vector<80x147xbf16>
    %c0_3 = arith.constant 0 : index
    %c0_4 = arith.constant 0 : index
    %2 = vector.load %arg3[%c0_3, %c0_4] : memref<147x64xbf16, #tpu.memory_space<vmem>>, vector<147x64xbf16>
    %cst = arith.constant dense<0.000000e+00> : vector<80x64xf32>
    %3 = tpu.matmul %1, %2, %cst {dimension_numbers = #tpu.dot_dimension_numbers<[1], [0], [0], [1], [0, 0, 1, 1], [], []>} : vector<80x147xbf16>, vector<147x64xbf16>, vector<80x64xf32> -> vector<80x64xf32>
    %c0_5 = arith.constant 0 : index
    %c0_6 = arith.constant 0 : index
    %4 = vector.load %arg4[%c0_5, %c0_6] : memref<2x64xf32, #tpu.memory_space<vmem>>, vector<1x64xf32>
    %5 = vector.broadcast %4 : vector<1x64xf32> to vector<80x64xf32>
    %6 = arith.mulf %3, %5 : vector<80x64xf32>
    %c1 = arith.constant 1 : index
    %c0_7 = arith.constant 0 : index
    %7 = vector.load %arg4[%c1, %c0_7] : memref<2x64xf32, #tpu.memory_space<vmem>>, vector<1x64xf32>
    %8 = vector.broadcast %7 : vector<1x64xf32> to vector<80x64xf32>
    %9 = arith.addf %6, %8 : vector<80x64xf32>
    %cst_8 = arith.constant 0.000000e+00 : f32
    %10 = vector.broadcast %cst_8 : f32 to vector<80x64xf32>
    %11 = arith.maximumf %9, %10 : vector<80x64xf32>
    %12 = arith.truncf %11 : vector<80x64xf32> to vector<80x64xbf16>
    %13 = vector.shape_cast %12 : vector<80x64xbf16> to vector<5x16x64xbf16>
    %14 = vector.extract_strided_slice %13 {offsets = [1, 0, 0], sizes = [2, 16, 64], strides = [1, 1, 1]} : vector<5x16x64xbf16> to vector<2x16x64xbf16>
    %15 = vector.extract_strided_slice %13 {offsets = [3, 0, 0], sizes = [2, 16, 64], strides = [1, 1, 1]} : vector<5x16x64xbf16> to vector<2x16x64xbf16>
    %16 = vector.extract_strided_slice %13 {offsets = [0, 0, 0], sizes = [2, 16, 64], strides = [1, 1, 1]} : vector<5x16x64xbf16> to vector<2x16x64xbf16>
    %17 = arith.maximumf %15, %14 : vector<2x16x64xbf16>
    %18 = arith.maximumf %17, %16 : vector<2x16x64xbf16>
    %19 = vector.extract_strided_slice %18 {offsets = [0, 0, 0], sizes = [2, 8, 64], strides = [1, 1, 1]} : vector<2x16x64xbf16> to vector<2x8x64xbf16>
    %20 = vector.extract_strided_slice %18 {offsets = [0, 8, 0], sizes = [2, 8, 64], strides = [1, 1, 1]} : vector<2x16x64xbf16> to vector<2x8x64xbf16>
    %21 = arith.maximumf %20, %19 : vector<2x8x64xbf16>
    %22 = vector.extract_strided_slice %21 {offsets = [0, 0, 0], sizes = [2, 1, 64], strides = [1, 1, 1]} : vector<2x8x64xbf16> to vector<2x1x64xbf16>
    %23 = vector.extract_strided_slice %21 {offsets = [0, 1, 0], sizes = [2, 7, 64], strides = [1, 1, 1]} : vector<2x8x64xbf16> to vector<2x7x64xbf16>
    %24 = vector.extract_strided_slice %19 {offsets = [0, 0, 0], sizes = [2, 7, 64], strides = [1, 1, 1]} : vector<2x8x64xbf16> to vector<2x7x64xbf16>
    %25 = arith.maximumf %23, %24 : vector<2x7x64xbf16>
    %26 = tpu.concatenate %22, %25 in 1 : vector<2x1x64xbf16>, vector<2x7x64xbf16> -> vector<2x8x64xbf16>
    %27 = arith.extf %26 : vector<2x8x64xbf16> to vector<2x8x64xf32>
    %c0_9 = arith.constant 0 : index
    %c0_10 = arith.constant 0 : index
    %c0_11 = arith.constant 0 : index
    %c0_12 = arith.constant 0 : index
    %c0_13 = arith.constant 0 : index
    %28 = vector.load %arg5[%c0_9, %c0_10, %c0_11, %c0_12, %c0_13] : memref<1x1x2x8x64xf32, #tpu.memory_space<vmem>>, vector<1x1x2x8x64xf32>
    %29 = vector.shape_cast %28 : vector<1x1x2x8x64xf32> to vector<2x8x64xf32>
    %30 = vector.shape_cast %27 : vector<2x8x64xf32> to vector<1x1x2x8x64xf32>
    tpu.vector_store %arg5[%c0_9, %c0_10, %c0_11, %c0_12, %c0_13], %30 {strides = array<i32>} : memref<1x1x2x8x64xf32, #tpu.memory_space<vmem>>, vector<1x1x2x8x64xf32>,
    return
  }
  func.func @transform_0(%arg0: i32, %arg1: i32) -> (i32, i32, i32, i32) {
    %c0_i32 = arith.constant 0 : i32
    %c0_i32_0 = arith.constant 0 : i32
    %c0_i32_1 = arith.constant 0 : i32
    return %arg0, %arg1, %c0_i32, %c0_i32_0 : i32, i32, i32, i32
  }
  func.func @transform_1(%arg0: i32, %arg1: i32) -> (i32, i32) {
    %c0_i32 = arith.constant 0 : i32
    %c0_i32_0 = arith.constant 0 : i32
    %c0_i32_1 = arith.constant 0 : i32
    return %c0_i32, %c0_i32_0 : i32, i32
  }
  func.func @transform_2(%arg0: i32, %arg1: i32) -> (i32, i32) {
    %c0_i32 = arith.constant 0 : i32
    %c0_i32_0 = arith.constant 0 : i32
    %c0_i32_1 = arith.constant 0 : i32
    return %c0_i32, %c0_i32_0 : i32, i32
  }
  func.func @transform_3(%arg0: i32, %arg1: i32) -> (i32, i32, i32, i32, i32) {
    %c0_i32 = arith.constant 0 : i32
    %c0_i32_0 = arith.constant 0 : i32
    %c0_i32_1 = arith.constant 0 : i32
    %c0_i32_2 = arith.constant 0 : i32
    return %arg0, %arg1, %c0_i32, %c0_i32_0, %c0_i32_1 : i32, i32, i32, i32, i32
  }
}

</mosaic_0001>

<bundles_post_ra>
// kernel: thermal_stem_forward.1
= control target key start
LH: loop header
LB: loop body
LE: loop exit
PB: predicated region body
PF: predicated region fallthrough
CT: control target
= control target key end

     0   :  { %8 = vsyncpa [#allocation3], 0  ;;  %s1134_s0 = inlined_call_operand.vmem [shape: bf16[2,4,80,147], index: 0, kind: input, shape index: {}]   ;;  %s1135_s1 = inlined_call_operand.vmem [shape: bf16[147,64], index: 1, kind: input, shape index: {}]   ;;  %s1136_s2 = inlined_call_operand.vmem [shape: f32[2,64], index: 2, kind: input, shape index: {}]   ;;  %s1137_s3 = inlined_call_operand.hbm [shape: f32[2,4,2,8,64], index: 3, kind: output, shape index: {}]  }
   0x1   :  { %10 = vsyncpa [#allocation3 + $0x1], 0  ;;  %s906_s12 = smov 0   ;;  %s908_s13 = smov 0  }
   0x2   :  { %s910_s14 = smov 0   ;;  %s912_s15 = smov 0  }
   0x3   :  { %s914_s16 = smov 0   ;;  %s916_s17 = smov 0  }
   0x4   :  { %s918_s18 = smov 0   ;;  %s920_s19 = smov 0  }
   0x5 LB: > { %s625_s20 = sadd.s32 4294967295, %s879_s19   ;;  %s626_s21 = sadd.s32 4294967294, %s879_s19   ;;  %s879_s19 = sphi %s920_s19, %s16_s19   ;;  %s875_s18 = sphi %s918_s18, %s1148_s18   ;;  %s871_s17 = sphi %s916_s17, %s1147_s17   ;;  %s867_s16 = sphi %s914_s16, %s1146_s16   ;;  %s863_s15 = sphi %s912_s15, %s1145_s15   ;;  %s859_s14 = sphi %s910_s14, %s1144_s14   ;;  %s855_s13 = sphi %s908_s13, %s1143_s13   ;;  %s851_s12 = sphi %s906_s12, %s1142_s12  }
   0x6   : > { %s25_s22 = sadd.s32 1, %s871_s17  ;;  %s28_s23 = sadd.s32 1, %s875_s18 }
   0x7   : > { %p26_p0 = scmp.ge.s32.totalorder %s25_s22, 4  ;;  %p117_p1 = scmp.ne.s32.totalorder %s859_s14, %s855_s13 }
   0x8   : > { %p118_p2 = scmp.eq.s32.totalorder %s625_s20, 7  ;;  %p123_p5 = scmp.ne.s32.totalorder %s855_s13, %s851_s12 }
   0x9   : > { %s1150_s22 = smov (%p26_p0, %s25_s22), 0  ;;  %s1152_s23 = smov (!%p26_p0, %s28_s23), %s875_s18 }
   0xa   : > { %s103_s24 = ssub.s32 %s871_s17, %s1150_s22  ;;  %p957_p3 = por %p118_p2, %p117_p1 }
   0xb   : > { %p30_p4 = scmp.ge.s32.totalorder %s1152_s23, 2  ;;  %p124_p6 = scmp.eq.s32.totalorder %s626_s21, 7 }
   0xc   : > { %p629_p7 = scmp.ge.s32.totalorder %s879_s19, 1  ;;  %p160_p9 = scmp.lt.s32.totalorder %s879_s19, 9 }
   0xd   : > { %s1154_s23 = smov (%p30_p4, %s1152_s23), 0  ;;  %p966_p8 = por %p124_p6, %p123_p5 }
   0xe   : > { %s102_s27 = ssub.s32 %s875_s18, %s1154_s23  ;;  %s107_s28 = sadd.s32 1, %s859_s14 }
   0xf   : > { %s104_s29 = sor.u32 %s103_s24, %s102_s27  ;;  %p161_p10 = pnand %p629_p7, %p160_p9 }
  0x10   : > { %p105_p11 = scmp.eq.s32.totalorder %s104_s29, 0  ;;  %p188_p12 = scmp.lt.s32.totalorder (!%p161_p10), %s867_s16, 1 }
  0x11   : > { %164 = sbr.rel (%p161_p10) target bundleno = 315 (0x13b), region = 32  ;;  %p190_p13 = scmp.lt.s32.totalorder (!%p161_p10), %s863_s15, 3 }
  0x12   : > { %s975_s30 = scalar_select %p105_p11, %s859_s14, %s107_s28  }
  0x13   : > { %s660_s11 = sshll.u32 (!%p161_p10), %s863_s15, 1  ;;  %s883_s6 = smov (!%p161_p10), [#allocation2]  }
  0x14   : > { %s791_s7 = sshll.u32 (!%p161_p10), %s883_s6, 4  ;;  %s792_s7 = int_to_ptr.vmem [resolvable:$false] %s791_s7 }
  0x15   : > { %s793_s9 = scalar_lea.vmem (!%p161_p10), %s792_s7, 512 }
  0x16   : > { %v762_v0 = vld [vmem:[%s1135_s1 + $0x38] sm:$0xff]   ;;  %v881_v1 = vmov 0   ;;  %v763_v2 = vld [vmem:[%s1135_s1 + $0x30] sm:$0xff]   ;;  %v764_v3 = vld [vmem:[%s1135_s1 + $0x28] sm:$0xff]   ;;  %s189_s20 = scalar_select %p188_p12, %s867_s16, 1  ;;  %vm329_vm0 = vcmask 154624  }
  0x17   : > { %352 = vmatprep.subr.bf16.mxu0 %v881_v1  ;;  %665 = vmatprep.subr.bf16.mxu1 %v881_v1  ;;  %v765_v4 = vld [vmem:[%s1135_s1 + $0x20] sm:$0xff]   ;;  %s191_s21 = scalar_select %p190_p13, %s863_s15, 3  ;;  %v766_v5 = vld [vmem:[%s1135_s1 + $0x18] sm:$0xff]   ;;  %v767_v6 = vld [vmem:[%s1135_s1 + $0x10] sm:$0xff]   ;;  %vm345_vm1 = vcmask 1040384   ;;  %vm346_vm2 = vcmask 1041408  }
  0x18   : > { %353 = vmatpush1.bf16.msra.mxu0 %v762_v0  ;;  %675 = vmatpush1.bf16.msra.mxu1 %v762_v0  ;;  %s686_s24 = smul.u32 80, %s189_s20  ;;  %v768_v9 = vld [vmem:[%s1135_s1 + $0x8] sm:$0xff]   ;;  %v882_v10 = vmov 65535   ;;  %v769_v12 = vld [vmem:[%s1135_s1] sm:$0xff]   ;;  %vm515_vm3 = vsmask.f32 256 }
  0x19   : > { %354 = vmatprep.subr.bf16.mxu0 %v881_v1  ;;  %666 = vmatprep.subr.bf16.mxu1 %v881_v1  ;;  %s685_s27 = smul.u32 20, %s191_s21  ;;  %v347_v11 = vsel %vm345_vm1, 4294967295, %v882_v10  ;;  %v770_v13 = vld [vmem:[%s1135_s1 + $0x48] ss:$0 sps:$4 sm:$0x33]   ;;  %v771_v16 = vld [vmem:[%s1135_s1 + $0x40] sm:$0xff]   ;;  %vm1060_vm4 = vmand %vm345_vm1, %vm515_vm3 }
  0x1a   : > { %v348_v14 = vsel %vm346_vm2, %v347_v11, 0  ;;  %v657_v31 = vld [vmem:[%s1136_s2] ss:$0 sm:$0xff]  ;;  %v658_v38 = vld [vmem:[%s1136_s2 + $0x1] ss:$0 sm:$0xff]  ;;  %s661_s20 = sshll.u32 %s867_s16, 3 }
  0x1b   : > { %s194_s4 = sadd.s32 %s686_s24, %s685_s27  ;;  %v350_v15 = vand.u32 %v770_v13, %v348_v14  ;;  %vm521_vm5 = vcmask 523264   ;;  %s537_s21 = sadd.s32 %s661_s20, %s660_s11 }
  0x1c   : > { %355 = vmatpush1.bf16.msra.mxu0 %v763_v2  ;;  %676 = vmatpush1.bf16.msra.mxu1 %v763_v2  ;;  %s631_s5 = sshll.u32 %s194_s4, 2  ;;  %s662_s27 = sshll.u32 %s537_s21, 7 }
  0x1d   : > { %356 = vmatprep.subr.bf16.mxu0 %v881_v1  ;;  %667 = vmatprep.subr.bf16.mxu1 %v881_v1  ;;  %s1009_s8 = scalar_lea.vmem %s1134_s0, %s631_s5  ;;  %s1076_s29 = scalar_lea.hbm %s1137_s3, %s662_s27 }
  0x1e   : > { %v774_v7 = vld [vmem:[%s1009_s8 + $0x4] ss:$8 sps:$4 sm:$0xff]   ;;  %v777_v8 = vld [vmem:[%s1009_s8 + $0x34] ss:$8 sps:$4 sm:$0xff]   ;;  %v772_v17 = vld [vmem:[%s1009_s8] ss:$8 sps:$4 sm:$0xff]  }
  0x1f   : > { %652 = vmatprep.mubr.msk.bf16.mxu0 %vm329_vm0, %v774_v7  ;;  %655 = vmatprep.mubr.msk.bf16.mxu1 %vm329_vm0, %v777_v8  ;;  %v775_v18 = vld [vmem:[%s1009_s8 + $0x30] ss:$8 sps:$4 sm:$0xff]   ;;  %v778_v19 = vld [vmem:[%s1009_s8 + $0x14] ss:$8 sps:$4 sm:$0xff]   ;;  %v781_v20 = vld [vmem:[%s1009_s8 + $0x44] ss:$8 sps:$4 sm:$0xff]  }
  0x20   : > { %357 = vmatpush1.bf16.msra.mxu0 %v764_v3  ;;  %677 = vmatpush1.bf16.msra.mxu1 %v764_v3  ;;  %v780_v21 = vld [vmem:[%s1009_s8 + $0x10] ss:$8 sps:$4 sm:$0xff]   ;;  %v783_v22 = vld [vmem:[%s1009_s8 + $0x40] ss:$8 sps:$4 sm:$0xff]   ;;  %v784_v23 = vld [vmem:[%s1009_s8 + $0x24] ss:$8 sps:$4 sm:$0xff]  }
  0x21   : > { %358 = vmatprep.subr.bf16.mxu0 %v881_v1  ;;  %668 = vmatprep.subr.bf16.mxu1 %v881_v1  ;;  %v786_v24 = vld [vmem:[%s1009_s8 + $0x20] ss:$8 sps:$4 sm:$0xff]   ;;  %s185_s8 = sand.u32 1, %s855_s13  }
  0x22   : > { %s630_s10 = sshll.u32 %s185_s8, 4  ;;  %s1083_s4 = scalar_lea.sflag [#allocation3], %s185_s8 }
  0x23   : > { %s187_s24 = scalar_lea.vmem [#allocation2], %s630_s10 }
  0x24   : > { %359 = vmatpush1.bf16.msra.mxu0 %v765_v4  ;;  %678 = vmatpush1.bf16.msra.mxu1 %v765_v4  ;;  %s540_s28 = sshll.u32 %s187_s24, 4  ;;  %s1078_s28 = int_to_ptr.vmem [resolvable:$true] %s540_s28 }
  0x25   : > { %360 = vmatprep.subr.bf16.mxu0 %v881_v1  ;;  %669 = vmatprep.subr.bf16.mxu1 %v881_v1  ;;  %s787_s5 = scalar_lea.vmem %s1078_s28, 256  ;;  %p794_p4 = scmp.lt.s32.totalorder %s1078_s28, %s792_s7 }
  0x26   : > { %p788_p0 = scmp.ne.s32.totalorder %s1078_s28, %s787_s5  ;;  %p795_p5 = scmp.lt.s32.totalorder %s793_s9, %s787_s5 }
  0x28   : > { %361 = vmatpush1.bf16.msra.mxu0 %v766_v5  ;;  %679 = vmatpush1.bf16.msra.mxu1 %v766_v5  ;;  %p789_p1 = pnand %p788_p0, %p957_p3  ;;  %p796_p6 = por %p795_p5, %p794_p4 }
  0x29   : > { %362 = vmatprep.subr.bf16.mxu0 %v881_v1  ;;  %670 = vmatprep.subr.bf16.mxu1 %v881_v1 }
  0x2a   : > { %p790_p2 = pneg %p789_p1 }
  0x2c   : > { %363 = vmatpush1.bf16.msra.mxu0 %v767_v6  ;;  %680 = vmatpush1.bf16.msra.mxu1 %v767_v6  ;;  %p797_p7 = pnand %p796_p6, %p790_p2 }
  0x2d   : > { %364 = vmatprep.subr.bf16.mxu0 %v881_v1  ;;  %671 = vmatprep.subr.bf16.mxu1 %v881_v1 }
  0x30   : > { %365 = vmatpush1.bf16.msra.mxu0 %v768_v9  ;;  %681 = vmatpush1.bf16.msra.mxu1 %v768_v9 }
  0x31   : > { %366 = vmatprep.subr.bf16.mxu0 %v881_v1  ;;  %672 = vmatprep.subr.bf16.mxu1 %v881_v1 }
  0x34   : > { %367 = vmatpush1.bf16.msra.mxu0 %v769_v12  ;;  %682 = vmatpush1.bf16.msra.mxu1 %v769_v12 }
  0x35   : > { %380 = vmatprep.subr.bf16.mxu0 %v881_v1  ;;  %673 = vmatprep.subr.bf16.mxu1 %v881_v1 }
  0x38   : > { %381 = vmatpush2.bf16.msra.mxu0 %v350_v15  ;;  %683 = vmatpush2.bf16.msra.mxu1 %v350_v15 }
  0x39   : > { %382 = vmatprep.subr.bf16.mxu0 %v881_v1  ;;  %674 = vmatprep.subr.bf16.mxu1 %v881_v1 }
  0x3c   : > { %383 = vmatpush2.bf16.msra.mxu0 %v771_v16  ;;  %684 = vmatpush2.bf16.msra.mxu1 %v771_v16 }
  0x3f   : > { %385 = vmatmul.mubr.bf16.vlgmr.msra.gmra.mxu0 %v772_v17  ;;  %409 = vmatmul.mubr.bf16.vlgmr.msra.gmra.mxu1 %v775_v18 }
  0x40   : > { %653 = vmatprep.mubr.msk.bf16.mxu0 %vm329_vm0, %v778_v19  ;;  %656 = vmatprep.mubr.msk.bf16.mxu1 %vm329_vm0, %v781_v20 }
  0x47   : > { %393 = vmatmul.mubr.bf16.gmra.mxu0 %v780_v21  ;;  %417 = vmatmul.mubr.bf16.gmra.mxu1 %v783_v22 }
  0x48   : > { %654 = vmatprep.mubr.msk.bf16.mxu0 %vm329_vm0, %v784_v23 }
  0x4f   : > { %401 = vmatmul.mubr.bf16.gmra.mxu0 %v786_v24 }
  0xff   : > { %v386_v25 = vpop.f32.mrf.mxu0  ;;  %v410_v26 = vpop.f32.mrf.mxu1 }
 0x100   : > { %v436_v32 = vmul.f32 %v657_v31, %v410_v26  ;;  %v430_v41 = vmul.f32 %v657_v31, %v386_v25 }
 0x101   : > { %v388_v27 = vpop.f32.mrf.mxu0  ;;  %v412_v28 = vpop.f32.mrf.mxu1 }
 0x102   : > { %v451_v42 = vadd.f32 %v658_v38, %v436_v32  ;;  %v445_v51 = vadd.f32 %v658_v38, %v430_v41 }
 0x103   : > { %v389_v29 = vpop.f32.mrf.mxu0  ;;  %v413_v30 = vpop.f32.mrf.mxu1 }
 0x104   : > { %v437_v35 = vmul.f32 %v657_v31, %v413_v30  ;;  %v431_v39 = vmul.f32 %v657_v31, %v389_v29  ;;  %v461_v52 = vmax.f32 %v451_v42, 0.0  ;;  %v455_v0 = vmax.f32 %v445_v51, 0.0 }
 0x105   : > { %v391_v33 = vpop.f32.mrf.mxu0  ;;  %v415_v34 = vpop.f32.mrf.mxu1 }
 0x106   : > { %v452_v45 = vadd.f32 %v658_v38, %v437_v35  ;;  %v446_v48 = vadd.f32 %v658_v38, %v431_v39 }
 0x107   : > { %v394_v36 = vpop.f32.mrf.mxu0  ;;  %v418_v37 = vpop.f32.mrf.mxu1 }
 0x108   : > { %v432_v40 = vmul.f32 %v657_v31, %v394_v36  ;;  %v462_v55 = vmax.f32 %v452_v45, 0.0  ;;  %v438_v56 = vmul.f32 %v657_v31, %v418_v37  ;;  %v456_v60 = vmax.f32 %v446_v48, 0.0 }
 0x109   : > { %v396_v43 = vpop.f32.mrf.mxu0  ;;  %v420_v44 = vpop.f32.mrf.mxu1 }
 0x10a   : > { %v447_v49 = vadd.f32 %v658_v38, %v432_v40  ;;  %v468_v2 = vpack.c.bf16 %v462_v55, %v461_v52  ;;  %v453_v3 = vadd.f32 %v658_v38, %v438_v56  ;;  %v465_v8 = vpack.c.bf16 %v456_v60, %v455_v0 }
 0x10b   : > { %v397_v46 = vpop.f32.mrf.mxu0  ;;  %v421_v47 = vpop.f32.mrf.mxu1 }
 0x10c   : > { %v433_v50 = vmul.f32 %v657_v31, %v397_v46  ;;  %v439_v58 = vmul.f32 %v657_v31, %v421_v47  ;;  %v457_v61 = vmax.f32 %v447_v49, 0.0  ;;  %v463_v12 = vmax.f32 %v453_v3, 0.0 }
 0x10d   : > { %v399_v53 = vpop.f32.mrf.mxu0  ;;  %v423_v54 = vpop.f32.mrf.mxu1 }
 0x10e   : > { %v448_v57 = vadd.f32 %v658_v38, %v433_v50  ;;  %v454_v5 = vadd.f32 %v658_v38, %v439_v58 }
 0x10f   : > { %v402_v59 = vpop.f32.mrf.mxu0 }
 0x110   : > { %v458_v62 = vmax.f32 %v448_v57, 0.0  ;;  %v434_v63 = vmul.f32 %v657_v31, %v402_v59  ;;  %v464_v14 = vmax.f32 %v454_v5, 0.0 }
 0x111   : > { %v404_v1 = vpop.f32.mrf.mxu0 }
 0x112   : > { %v466_v4 = vpack.c.bf16 %v458_v62, %v457_v61  ;;  %v449_v6 = vadd.f32 %v658_v38, %v434_v63  ;;  %v469_v23 = vpack.c.bf16 %v464_v14, %v463_v12 }
 0x113   : > { %v405_v7 = vpop.f32.mrf.mxu0 }
 0x114   : > { %v470_v9 = vmax.bf16 %v468_v2, %v466_v4  ;;  %v435_v10 = vmul.f32 %v657_v31, %v405_v7  ;;  %v459_v16 = vmax.f32 %v449_v6, 0.0 }
 0x115   : > { %v407_v11 = vpop.f32.mrf.mxu0 }
 0x116   : > { %v472_v13 = vmax.bf16 %v470_v9, %v465_v8  ;;  %v450_v15 = vadd.f32 %v658_v38, %v435_v10 }
 0x118   : > { %v476_v17 = vrot.slane %v472_v13, 4  ;;  %v483_v18 = vshrl.u32 %v472_v13, 16  ;;  %v486_v19 = vshll.u32 %v472_v13, 16  ;;  %v460_v20 = vmax.f32 %v450_v15, 0.0 }
 0x11a   : > { %v485_v21 = vrot.slane %v483_v18, 3  ;;  %v488_v22 = vrot.slane %v486_v19, 4  ;;  %v467_v24 = vpack.c.bf16 %v460_v20, %v459_v16  ;;  %v480_v25 = vmax.bf16 %v476_v17, %v472_v13 }
 0x11c   : > { %v489_v26 = vor.u32 %v488_v22, %v485_v21  ;;  %v471_v27 = vmax.bf16 %v469_v23, %v467_v24  ;;  %v504_v31 = vrot.slane %v480_v25, 4 }
 0x11e   : > { %v500_v28 = vmax.bf16 %v489_v26, %v480_v25  ;;  %v473_v29 = vmax.bf16 %v471_v27, %v466_v4 }
 0x120   : > { %v510_v32 = vrot.slane %v500_v28, 4  ;;  %v477_v33 = vrot.slane %v473_v29, 4  ;;  %v491_v34 = vshrl.u32 %v473_v29, 16  ;;  %v494_v35 = vshll.u32 %v473_v29, 16 }
 0x122   : > { %v493_v36 = vrot.slane %v491_v34, 3  ;;  %v496_v37 = vrot.slane %v494_v35, 4  ;;  %v517_v38 = vsel %vm1060_vm4, %v504_v31, %v510_v32  ;;  %v481_v40 = vmax.bf16 %v477_v33, %v473_v29 }
 0x123   : > { %v519_v39 = vunpack.c.l.bf16 %v517_v38 }
 0x124   : > { %v497_v41 = vor.u32 %v496_v37, %v493_v36  ;;  %v505_v43 = vrot.slane %v481_v40, 4 }
 0x125   : > { %522 = vst.msk [vmem:[%s187_s24] sm:$0xff] %vm521_vm5, %v519_v39 }
 0x126   : > { %v501_v42 = vmax.bf16 %v497_v41, %v481_v40 }
 0x128   : > { %v511_v44 = vrot.slane %v501_v42, 4 }
 0x12a   : > { %v518_v45 = vsel %vm1060_vm4, %v505_v43, %v511_v44 }
 0x12b   : > { %v520_v46 = vunpack.c.l.bf16 %v518_v45 }
 0x12d   : > { %523 = vst.msk [vmem:[%s187_s24 + $0x8] sm:$0xff] %vm521_vm5, %v520_v46 }
 0x12e   : > { %800 = shalt.err (!%p797_p7)
}
 0x12f   : > { %s801_s8 = scalar_lea.hbm %s1076_s29, 256  ;;  %s805_s20 = scalar_lea.hbm %s1137_s3, 2048 }
 0x130   : > { %p802_p9 = scmp.ne.s32.totalorder %s1076_s29, %s801_s8  ;;  %p806_p12 = scmp.lt.s32.totalorder %s1076_s29, %s1137_s3 }
 0x131   : > { %p807_p13 = scmp.lt.s32.totalorder %s805_s20, %s801_s8 }
 0x132   : > { %p803_p10 = pnand %p802_p9, %p957_p3 }
 0x133   : > { %p808_p0 = por %p807_p13, %p806_p12 }
 0x134   : > { %p804_p11 = pneg %p803_p10 }
 0x136   : > { %p809_p1 = pnand %p808_p0, %p804_p11 }
 0x138   : > { %812 = shalt.err (!%p809_p1)
}
 0x139   : > { %s884_s27 = smov 128   ;;  %s885_s15 = smov 8  }
 0x13a   : > { %687 = dma.vmem_to_hbm [thread:$0]  (%p957_p3), %s1078_s28, 256, %s1076_s29, %s1083_s4, %s884_s27, %s884_s27, %s885_s15  }
 0x13b PF: > { %p693_p2 = scmp.ge.s32.totalorder %s879_s19, 2  ;;  %s555_s16 = sand.u32 1, %s851_s12  }
 0x13c   : > { %s556_s5 = scalar_lea.sflag [#allocation3], %s555_s16 }
 0x13d   : > { %p690_p4 = pnand %p693_p2, %p966_p8 }
 0x13f   : > { %p691_p5 = pneg %p690_p4 }
 0x141   : > { %846 = dma.done.wait (%p691_p5), %s556_s5, 256  }
 0x142   : > { %848 = vsyncadd (%p691_p5), %s556_s5, 4294967040  ;;  %s16_s19 = sadd.s32 1, %s879_s19   ;;  %s1142_s12 = smov %s855_s13 }
 0x143   : > { %p13_p6 = scmp.ge.s32.totalorder %s16_s19, 10   ;;  %s1143_s13 = smov %s859_s14 }
 0x144   : > { %s1144_s14 = smov %s975_s30  ;;  %s1145_s15 = smov %s871_s17 }
 0x145   : > { %s1146_s16 = smov %s875_s18  ;;  %s1147_s17 = smov %s1150_s22 }
 0x146   : > { %s1148_s18 = smov %s1154_s23  ;;  %15 = sbr.rel (!%p13_p6) target bundleno = 5 (0x5), region = 67 }
 0x14b   :  { %561 = vsyncpa [#allocation3], 1 }
 0x14c   :  { %563 = vsyncpa [#allocation3 + $0x1], 1 }

</bundles_post_ra>
